<compile_context>
chip_gen: v6e
topology: v6e:2x2x1
jax: 0.10.0
libtpu: 0.0.40
codegen_flags: <defaults>
</compile_context>

<pallas_src>
import functools

import jax
import jax.numpy as jnp
from jax.experimental import pallas as pl
from jax.experimental.pallas import tpu as pltpu


LANE = 128                           # pad node axis AND feature/class axes to 128
VMEM_SOFT_CAP = 60 * 1024 * 1024     # stay under v7x's 64 MiB per-TC VMEM


def _round_up(x, m):
    return ((x + m - 1) // m) * m


# ---------------------------------------------------------------------------
# Fused Pallas kernel: all GraphConv layers + final log_softmax in one body
# ---------------------------------------------------------------------------
def _gcn_fused_kernel(*refs, n_layers, n_classes):
    """refs = (a, h, w0, b0, w1, b1, ..., out).

    Padded W rows/cols and bias entries are exactly zero, so padded feature
    lanes of H stay exactly zero through the whole matmul/bias chain; padded
    class columns are masked out of the softmax reduction.  Padded node rows
    (A rows are zero there) only ever hold the bias and are sliced off by the
    wrapper.
    """
    a_ref, h_ref = refs[0], refs[1]
    o_ref = refs[2 + 2 * n_layers]

    a = a_ref[...]                     # bf16 [n_pad, n_pad]
    h = h_ref[...]                     # f32  [n_pad, pad_0]

    # Layer loop unrolled at trace time; H stays in VMEM/vregs between layers.
    for li in range(n_layers):
        w_ref = refs[2 + 2 * li]
        b_ref = refs[3 + 2 * li]
        # Small H@W in f32, big A@(HW) in bf16 with f32 accumulation on the MXU.
        hw = jnp.dot(h, w_ref[...], preferred_element_type=jnp.float32)
        h = jnp.dot(a, hw.astype(jnp.bfloat16),
                    preferred_element_type=jnp.float32) + b_ref[...]

    # log_softmax over the class axis; mask padded class columns out of the
    # max / logsumexp.
    col = jax.lax.broadcasted_iota(jnp.int32, h.shape, dimension=1)
    valid = col < n_classes
    x = jnp.where(valid, h, jnp.float32(-1e30))
    m = jnp.max(x, axis=1, keepdims=True)
    s = x - m
    denom = jnp.sum(jnp.where(valid, jnp.exp(s), 0.0), axis=1, keepdims=True)
    o_ref[...] = (s - jnp.log(denom)).astype(o_ref.dtype)


# ---------------------------------------------------------------------------
# Wrapper: pad to lane-dense shapes, run the fused kernel once
# ---------------------------------------------------------------------------
@jax.jit
def gcn_forward(a_hat, features, params):
    """params: tuple of (W [f_in, f_out], b [f_out]) pairs."""
    n = a_hat.shape[0]
    f_in = features.shape[1]
    n_layers = len(params)
    n_classes = params[-1][0].shape[1]

    dims = [f_in] + [w.shape[1] for (w, _) in params]
    pads = [_round_up(d, LANE) for d in dims]     # per-layer feature padding
    n_pad = _round_up(n, LANE)                    # lane-dense node axis

    # A_hat in bf16 (dominant N^2 operand); features / weights stay f32.
    a_p = jnp.zeros((n_pad, n_pad), jnp.bfloat16).at[:n, :n].set(
        a_hat.astype(jnp.bfloat16))
    h_p = jnp.zeros((n_pad, pads[0]), jnp.float32).at[:n, :f_in].set(features)

    wb_args, wb_specs = [], []
    wb_bytes = 0
    for li, (w, b) in enumerate(params):
        pi, po = pads[li], pads[li + 1]
        w_p = jnp.zeros((pi, po), jnp.float32).at[:w.shape[0], :w.shape[1]].set(w)
        b_p = jnp.zeros((1, po), jnp.float32).at[0, :b.shape[0]].set(b)
        wb_args += [w_p, b_p]
        wb_specs += [pl.BlockSpec((pi, po), lambda: (0, 0)),
                     pl.BlockSpec((1, po), lambda: (0, 0))]
        wb_bytes += 4 * (pi * po + po)

    a_bytes = 2 * n_pad * n_pad
    h_bytes = 4 * n_pad * pads[0]
    o_bytes = 4 * n_pad * pads[-1]
    # slack for intermediate H / HW temporaries inside the body
    scratch_bytes = 4 * 4 * n_pad * max(pads)
    vmem_bytes = 2 * (a_bytes + h_bytes + o_bytes + wb_bytes) + scratch_bytes
    vmem_limit = int(min(max(vmem_bytes, 16 * 1024 * 1024), VMEM_SOFT_CAP))
    # TODO(synk): once vmem_bytes exceeds VMEM_SOFT_CAP (~N > 3k bf16 on v7x),
    # switch to a row-tiled, HW-hoisted, block-sparse path: per layer compute
    # HW once, tile A over (TM rows, TK src cols) with the reduction axis last
    # ("parallel","arbitrary"), scalar-prefetch the nonzero A-tile list
    # (PrefetchScalarGridSpec), and keep the W stack in HBM via pl.ANY.

    flops = sum(2 * (n_pad * pads[li] * pads[li + 1]
                     + n_pad * n_pad * pads[li + 1])
                for li in range(n_layers))
    bytes_accessed = a_bytes + h_bytes + o_bytes + wb_bytes

    kernel = functools.partial(
        _gcn_fused_kernel, n_layers=n_layers, n_classes=n_classes)

    out_p = pl.pallas_call(
        kernel,
        out_shape=jax.ShapeDtypeStruct((n_pad, pads[-1]), jnp.float32),
        # No grid: single invocation, whole (VMEM-resident) problem on-chip.
        in_specs=[pl.BlockSpec((n_pad, n_pad), lambda: (0, 0)),
                  pl.BlockSpec((n_pad, pads[0]), lambda: (0, 0))] + wb_specs,
        out_specs=pl.BlockSpec((n_pad, pads[-1]), lambda: (0, 0)),
        compiler_params=pltpu.CompilerParams(vmem_limit_bytes=vmem_limit),
        cost_estimate=pl.CostEstimate(
            flops=flops,
            transcendentals=n_pad * pads[-1],
            bytes_accessed=bytes_accessed),
    )(a_p, h_p, *wb_args)

    return out_p[:n, :n_classes]


# ---------------------------------------------------------------------------
# Glue: graph normalization + parameter init (deterministic, in-script)
# ---------------------------------------------------------------------------
def normalized_adjacency(adj):
    """A_hat = D_in^{-1/2} A D_out^{-1/2}, degrees clamped at 1 (DGL 'both')."""
    adj = adj.astype(jnp.float32)
    in_deg = jnp.clip(jnp.sum(adj, axis=1), 1.0, None)    # per dst node
    out_deg = jnp.clip(jnp.sum(adj, axis=0), 1.0, None)   # per src node
    norm_dst = 1.0 / jnp.sqrt(in_deg)
    norm_src = 1.0 / jnp.sqrt(out_deg)
    return norm_dst[:, None] * adj * norm_src[None, :]


def xavier_uniform(key, f_in, f_out):
    limit = jnp.sqrt(6.0 / (f_in + f_out))
    return jax.random.uniform(key, (f_in, f_out), jnp.float32, -limit, limit)


def init_gcn_params(key, in_feats, n_hidden, n_classes, n_layers):
    assert n_layers >= 2
    dims = [in_feats] + [n_hidden] * (n_layers - 1) + [n_classes]
    params = []
    for li in range(n_layers):
        key, wk = jax.random.split(key)
        w = xavier_uniform(wk, dims[li], dims[li + 1])
        b = jnp.zeros((dims[li + 1],), jnp.float32)   # DGL GraphConv bias init
        params.append((w, b))
    return params


# Pure-JAX f32 reference (same math) for a correctness sanity check.
def gcn_forward_ref(a_hat, features, params):
    h = features
    for (w, b) in params:
        h = a_hat @ (h @ w) + b[None, :]
    m = jnp.max(h, axis=1, keepdims=True)
    s = h - m
    return s - jnp.log(jnp.sum(jnp.exp(s), axis=1, keepdims=True))


if __name__ == "__main__":
    key = jax.random.PRNGKey(0)

    # Small synthetic graph + features.
    N, in_feats, n_hidden, n_classes, n_layers = 64, 16, 32, 8, 3

    key, k_adj, k_feat, k_par = jax.random.split(key, 4)
    # Random sparse-ish directed adjacency (dst, src), ~10% density, no self loops.
    adj = (jax.random.uniform(k_adj, (N, N)) < 0.1).astype(jnp.float32)
    adj = adj * (1.0 - jnp.eye(N, dtype=jnp.float32))
    a_hat = normalized_adjacency(adj)

    features = jax.random.normal(k_feat, (N, in_feats), jnp.float32)
    params = tuple(init_gcn_params(k_par, in_feats, n_hidden, n_classes, n_layers))

    out = gcn_forward(a_hat, features, params)
    out = jax.block_until_ready(out)

    ref = gcn_forward_ref(a_hat, features, params)
    assert out.shape == (N, n_classes)
    # bf16 A / bf16 A@(HW) contraction with f32 accumulation -> looser tolerance.
    assert jnp.allclose(out, ref, atol=5e-2, rtol=5e-2)

    print("KERNEL_OK")
</pallas_src>

<mosaic_0001>
module attributes {stable_mosaic.version = 11 : i64} {
  func.func @_gcn_fused_kernel(%arg0: memref<128x128xbf16, #tpu.memory_space<vmem>>, %arg1: memref<128x128xf32, #tpu.memory_space<vmem>>, %arg2: memref<128x128xf32, #tpu.memory_space<vmem>>, %arg3: memref<1x128xf32, #tpu.memory_space<vmem>>, %arg4: memref<128x128xf32, #tpu.memory_space<vmem>>, %arg5: memref<1x128xf32, #tpu.memory_space<vmem>>, %arg6: memref<128x128xf32, #tpu.memory_space<vmem>>, %arg7: memref<1x128xf32, #tpu.memory_space<vmem>>, %arg8: memref<128x128xf32, #tpu.memory_space<vmem>>) attributes {dimension_semantics = [], scalar_prefetch = 0 : i64, scratch_operands = 0 : i64, tpu.core_type = #tpu.core_type<tc>} {
    %c0 = arith.constant 0 : index
    %c0_0 = arith.constant 0 : index
    %0 = vector.load %arg0[%c0, %c0_0] : memref<128x128xbf16, #tpu.memory_space<vmem>>, vector<128x128xbf16>
    %c0_1 = arith.constant 0 : index
    %c0_2 = arith.constant 0 : index
    %1 = vector.load %arg1[%c0_1, %c0_2] : memref<128x128xf32, #tpu.memory_space<vmem>>, vector<128x128xf32>
    %c0_3 = arith.constant 0 : index
    %c0_4 = arith.constant 0 : index
    %2 = vector.load %arg2[%c0_3, %c0_4] : memref<128x128xf32, #tpu.memory_space<vmem>>, vector<128x128xf32>
    %cst = arith.constant dense<0.000000e+00> : vector<128x128xf32>
    %3 = tpu.matmul %1, %2, %cst {dimension_numbers = #tpu.dot_dimension_numbers<[1], [0], [0], [1], [0, 0, 1, 1], [], []>} : vector<128x128xf32>, vector<128x128xf32>, vector<128x128xf32> -> vector<128x128xf32>
    %4 = arith.truncf %3 : vector<128x128xf32> to vector<128x128xbf16>
    %cst_5 = arith.constant dense<0.000000e+00> : vector<128x128xf32>
    %5 = tpu.matmul %0, %4, %cst_5 {dimension_numbers = #tpu.dot_dimension_numbers<[1], [0], [0], [1], [0, 0, 1, 1], [], []>} : vector<128x128xbf16>, vector<128x128xbf16>, vector<128x128xf32> -> vector<128x128xf32>
    %c0_6 = arith.constant 0 : index
    %c0_7 = arith.constant 0 : index
    %6 = vector.load %arg3[%c0_6, %c0_7] : memref<1x128xf32, #tpu.memory_space<vmem>>, vector<1x128xf32>
    %7 = vector.broadcast %6 : vector<1x128xf32> to vector<128x128xf32>
    %8 = arith.addf %5, %7 : vector<128x128xf32>
    %c0_8 = arith.constant 0 : index
    %c0_9 = arith.constant 0 : index
    %9 = vector.load %arg4[%c0_8, %c0_9] : memref<128x128xf32, #tpu.memory_space<vmem>>, vector<128x128xf32>
    %cst_10 = arith.constant dense<0.000000e+00> : vector<128x128xf32>
    %10 = tpu.matmul %8, %9, %cst_10 {dimension_numbers = #tpu.dot_dimension_numbers<[1], [0], [0], [1], [0, 0, 1, 1], [], []>} : vector<128x128xf32>, vector<128x128xf32>, vector<128x128xf32> -> vector<128x128xf32>
    %11 = arith.truncf %10 : vector<128x128xf32> to vector<128x128xbf16>
    %cst_11 = arith.constant dense<0.000000e+00> : vector<128x128xf32>
    %12 = tpu.matmul %0, %11, %cst_11 {dimension_numbers = #tpu.dot_dimension_numbers<[1], [0], [0], [1], [0, 0, 1, 1], [], []>} : vector<128x128xbf16>, vector<128x128xbf16>, vector<128x128xf32> -> vector<128x128xf32>
    %c0_12 = arith.constant 0 : index
    %c0_13 = arith.constant 0 : index
    %13 = vector.load %arg5[%c0_12, %c0_13] : memref<1x128xf32, #tpu.memory_space<vmem>>, vector<1x128xf32>
    %14 = vector.broadcast %13 : vector<1x128xf32> to vector<128x128xf32>
    %15 = arith.addf %12, %14 : vector<128x128xf32>
    %c0_14 = arith.constant 0 : index
    %c0_15 = arith.constant 0 : index
    %16 = vector.load %arg6[%c0_14, %c0_15] : memref<128x128xf32, #tpu.memory_space<vmem>>, vector<128x128xf32>
    %cst_16 = arith.constant dense<0.000000e+00> : vector<128x128xf32>
    %17 = tpu.matmul %15, %16, %cst_16 {dimension_numbers = #tpu.dot_dimension_numbers<[1], [0], [0], [1], [0, 0, 1, 1], [], []>} : vector<128x128xf32>, vector<128x128xf32>, vector<128x128xf32> -> vector<128x128xf32>
    %18 = arith.truncf %17 : vector<128x128xf32> to vector<128x128xbf16>
    %cst_17 = arith.constant dense<0.000000e+00> : vector<128x128xf32>
    %19 = tpu.matmul %0, %18, %cst_17 {dimension_numbers = #tpu.dot_dimension_numbers<[1], [0], [0], [1], [0, 0, 1, 1], [], []>} : vector<128x128xbf16>, vector<128x128xbf16>, vector<128x128xf32> -> vector<128x128xf32>
    %c0_18 = arith.constant 0 : index
    %c0_19 = arith.constant 0 : index
    %20 = vector.load %arg7[%c0_18, %c0_19] : memref<1x128xf32, #tpu.memory_space<vmem>>, vector<1x128xf32>
    %21 = vector.broadcast %20 : vector<1x128xf32> to vector<128x128xf32>
    %22 = arith.addf %19, %21 : vector<128x128xf32>
    %23 = tpu.iota {dimensions = array<i32: 1>} : vector<128x128xi32>
    %c8_i32 = arith.constant 8 : i32
    %24 = vector.broadcast %c8_i32 : i32 to vector<128x128xi32>
    %25 = arith.cmpi slt, %23, %24 : vector<128x128xi32>
    %cst_20 = arith.constant -1.000000e+30 : f32
    %26 = vector.broadcast %cst_20 : f32 to vector<128x128xf32>
    %27 = arith.select %25, %22, %26 : vector<128x128xi1>, vector<128x128xf32>
    %cst_21 = arith.constant dense<0xFF800000> : vector<128xf32>
    %28 = vector.multi_reduction <maximumf>, %27, %cst_21 [1] : vector<128x128xf32> to vector<128xf32>
    %29 = vector.shape_cast %28 : vector<128xf32> to vector<128x1xf32>
    %30 = vector.broadcast %29 : vector<128x1xf32> to vector<128x128xf32>
    %31 = arith.subf %27, %30 : vector<128x128xf32>
    %32 = math.exp %31 : vector<128x128xf32>
    %cst_22 = arith.constant 0.000000e+00 : f32
    %33 = vector.broadcast %cst_22 : f32 to vector<128x128xf32>
    %34 = arith.select %25, %32, %33 : vector<128x128xi1>, vector<128x128xf32>
    %cst_23 = arith.constant dense<0.000000e+00> : vector<128xf32>
    %35 = vector.multi_reduction <add>, %34, %cst_23 [1] : vector<128x128xf32> to vector<128xf32>
    %36 = vector.shape_cast %35 : vector<128xf32> to vector<128x1xf32>
    %37 = math.log %36 : vector<128x1xf32>
    %38 = vector.broadcast %37 : vector<128x1xf32> to vector<128x128xf32>
    %39 = arith.subf %31, %38 : vector<128x128xf32>
    %c0_24 = arith.constant 0 : index
    %c0_25 = arith.constant 0 : index
    %40 = vector.load %arg8[%c0_24, %c0_25] : memref<128x128xf32, #tpu.memory_space<vmem>>, vector<128x128xf32>
    tpu.vector_store %arg8[%c0_24, %c0_25], %39 {strides = array<i32>} : memref<128x128xf32, #tpu.memory_space<vmem>>, vector<128x128xf32>,
    return
  }
}

</mosaic_0001>

<bundles_post_ra>
// kernel: gcn_forward.1
= control target key start
LH: loop header
LB: loop body
LE: loop exit
PB: predicated region body
PF: predicated region fallthrough
CT: control target
= control target key end

     0   :  { %s2148_s2 = inlined_call_operand.vmem [shape: f32[128,128], index: 2, kind: input, shape index: {}]   ;;  %s2149_s1 = inlined_call_operand.vmem [shape: f32[128,128], index: 1, kind: input, shape index: {}]   ;;  %s2150_s0 = inlined_call_operand.vmem [shape: bf16[128,128], index: 0, kind: input, shape index: {}]   ;;  %s2151_s4 = inlined_call_operand.vmem [shape: f32[128,128], index: 4, kind: input, shape index: {}]   ;;  %s2152_s3 = inlined_call_operand.vmem [shape: f32[1,128], index: 3, kind: input, shape index: {}]   ;;  %s2153_s6 = inlined_call_operand.vmem [shape: f32[128,128], index: 6, kind: input, shape index: {}]   ;;  %s2154_s5 = inlined_call_operand.vmem [shape: f32[1,128], index: 5, kind: input, shape index: {}]   ;;  %s2155_s7 = inlined_call_operand.vmem [shape: f32[1,128], index: 7, kind: input, shape index: {}]   ;;  %s2156_s8 = inlined_call_operand.vmem [shape: f32[128,128], index: 8, kind: output, shape index: {}]  }
   0x1   :  { %v77_v0 = vld [vmem:[%s2148_s2 + $0x78] sm:$0xff]  ;;  %v76_v1 = vld [vmem:[%s2148_s2 + $0x70] sm:$0xff]  ;;  %v75_v2 = vld [vmem:[%s2148_s2 + $0x68] sm:$0xff] }
   0x2   :  { %1299 = vmatprep.subr.mxu0 %v77_v0  ;;  %v74_v3 = vld [vmem:[%s2148_s2 + $0x60] sm:$0xff]  ;;  %v73_v5 = vld [vmem:[%s2148_s2 + $0x58] sm:$0xff]  ;;  %v72_v6 = vld [vmem:[%s2148_s2 + $0x50] sm:$0xff] }
   0x3   :  { %1300 = vmatpush3.msra.mxu0 %v77_v0  ;;  %v46_v4 = vld [vmem:[%s2149_s1] sm:$0xff]  ;;  %v71_v7 = vld [vmem:[%s2148_s2 + $0x48] sm:$0xff]  ;;  %v69_v9 = vld [vmem:[%s2148_s2 + $0x38] sm:$0xff] }
   0x4   :  { %1301 = vmatprep.subr.mxu0 %v76_v1  ;;  %1331 = vmatprep.mubr.f32.mxu0 %v46_v4  ;;  %v70_v8 = vld [vmem:[%s2148_s2 + $0x40] sm:$0xff]  ;;  %v68_v10 = vld [vmem:[%s2148_s2 + $0x30] sm:$0xff]  ;;  %v67_v11 = vld [vmem:[%s2148_s2 + $0x28] sm:$0xff] }
   0x5   :  { %1302 = vmatpush3.msra.mxu0 %v76_v1  ;;  %v66_v12 = vld [vmem:[%s2148_s2 + $0x20] sm:$0xff]  ;;  %v65_v13 = vld [vmem:[%s2148_s2 + $0x18] sm:$0xff]  ;;  %v64_v14 = vld [vmem:[%s2148_s2 + $0x10] sm:$0xff] }
   0x6   :  { %1303 = vmatprep.subr.mxu0 %v75_v2  ;;  %v63_v15 = vld [vmem:[%s2148_s2 + $0x8] sm:$0xff]  ;;  %v62_v16 = vld [vmem:[%s2148_s2] sm:$0xff]  ;;  %v48_v18 = vld [vmem:[%s2149_s1 + $0x10] sm:$0xff] }
   0x7   :  { %1304 = vmatpush3.msra.mxu0 %v75_v2  ;;  %v47_v17 = vld [vmem:[%s2149_s1 + $0x8] sm:$0xff]  ;;  %v49_v19 = vld [vmem:[%s2149_s1 + $0x18] sm:$0xff]  ;;  %v50_v20 = vld [vmem:[%s2149_s1 + $0x20] sm:$0xff] }
   0x8   :  { %1305 = vmatprep.subr.mxu0 %v74_v3  ;;  %v51_v21 = vld [vmem:[%s2149_s1 + $0x28] sm:$0xff]  ;;  %v52_v22 = vld [vmem:[%s2149_s1 + $0x30] sm:$0xff]  ;;  %v53_v23 = vld [vmem:[%s2149_s1 + $0x38] sm:$0xff] }
   0x9   :  { %1306 = vmatpush3.msra.mxu0 %v74_v3  ;;  %v54_v24 = vld [vmem:[%s2149_s1 + $0x40] sm:$0xff]  ;;  %v55_v25 = vld [vmem:[%s2149_s1 + $0x48] sm:$0xff]  ;;  %v56_v26 = vld [vmem:[%s2149_s1 + $0x50] sm:$0xff] }
   0xa   :  { %1307 = vmatprep.subr.mxu0 %v73_v5  ;;  %v57_v27 = vld [vmem:[%s2149_s1 + $0x58] sm:$0xff]  ;;  %v58_v28 = vld [vmem:[%s2149_s1 + $0x60] sm:$0xff]  ;;  %v59_v29 = vld [vmem:[%s2149_s1 + $0x68] sm:$0xff] }
   0xb   :  { %1308 = vmatpush3.msra.mxu0 %v73_v5  ;;  %v60_v30 = vld [vmem:[%s2149_s1 + $0x70] sm:$0xff]  ;;  %v61_v31 = vld [vmem:[%s2149_s1 + $0x78] sm:$0xff]  ;;  %v1779_v32 = vld [vmem:[%s2150_s0] sm:$0xff]  }
   0xc   :  { %1309 = vmatprep.subr.mxu0 %v72_v6  ;;  %1371 = vmatprep.mubr.bf16.mxu1 %v1779_v32  ;;  %v398_v33 = vld [vmem:[%s2151_s4 + $0x78] sm:$0xff]  ;;  %v397_v34 = vld [vmem:[%s2151_s4 + $0x70] sm:$0xff]  ;;  %v396_v35 = vld [vmem:[%s2151_s4 + $0x68] sm:$0xff] }
   0xd   :  { %1310 = vmatpush3.msra.mxu0 %v72_v6  ;;  %v395_v36 = vld [vmem:[%s2151_s4 + $0x60] sm:$0xff]  ;;  %v394_v37 = vld [vmem:[%s2151_s4 + $0x58] sm:$0xff]  ;;  %v393_v38 = vld [vmem:[%s2151_s4 + $0x50] sm:$0xff] }
   0xe   :  { %1311 = vmatprep.subr.mxu0 %v71_v7  ;;  %v392_v39 = vld [vmem:[%s2151_s4 + $0x48] sm:$0xff]  ;;  %v391_v40 = vld [vmem:[%s2151_s4 + $0x40] sm:$0xff]  ;;  %v390_v41 = vld [vmem:[%s2151_s4 + $0x38] sm:$0xff] }
   0xf   :  { %1312 = vmatpush3.msra.mxu0 %v71_v7  ;;  %v389_v42 = vld [vmem:[%s2151_s4 + $0x30] sm:$0xff]  ;;  %v388_v43 = vld [vmem:[%s2151_s4 + $0x28] sm:$0xff]  ;;  %v387_v44 = vld [vmem:[%s2151_s4 + $0x20] sm:$0xff] }
  0x10   :  { %1313 = vmatprep.subr.mxu0 %v70_v8  ;;  %v1821_v5 = vld [vmem:[%s2150_s0 + $0x8] sm:$0xff]   ;;  %v1826_v6 = vld [vmem:[%s2150_s0 + $0x10] sm:$0xff]   ;;  %v1833_v7 = vld [vmem:[%s2150_s0 + $0x18] sm:$0xff]  }
  0x11   :  { %1314 = vmatpush3.msra.mxu0 %v70_v8  ;;  %v1838_v8 = vld [vmem:[%s2150_s0 + $0x20] sm:$0xff]  }
  0x12   :  { %1315 = vmatprep.subr.mxu0 %v69_v9 }
  0x13   :  { %1316 = vmatpush3.msra.mxu0 %v69_v9  ;;  %v1845_v9 = vld [vmem:[%s2150_s0 + $0x28] sm:$0xff]  }
  0x14   :  { %1317 = vmatprep.subr.mxu0 %v68_v10 }
  0x15   :  { %1318 = vmatpush3.msra.mxu0 %v68_v10  ;;  %v1850_v10 = vld [vmem:[%s2150_s0 + $0x30] sm:$0xff]  }
  0x16   :  { %1319 = vmatprep.subr.mxu0 %v67_v11 }
  0x17   :  { %1320 = vmatpush3.msra.mxu0 %v67_v11  ;;  %v1857_v11 = vld [vmem:[%s2150_s0 + $0x38] sm:$0xff]  }
  0x18   :  { %1321 = vmatprep.subr.mxu0 %v66_v12 }
  0x19   :  { %1322 = vmatpush3.msra.mxu0 %v66_v12  ;;  %v386_v12 = vld [vmem:[%s2151_s4 + $0x18] sm:$0xff] }
  0x1a   :  { %1323 = vmatprep.subr.mxu0 %v65_v13 }
  0x1b   :  { %1324 = vmatpush3.msra.mxu0 %v65_v13  ;;  %v385_v13 = vld [vmem:[%s2151_s4 + $0x10] sm:$0xff] }
  0x1c   :  { %1325 = vmatprep.subr.mxu0 %v64_v14 }
  0x1d   :  { %1326 = vmatpush3.msra.mxu0 %v64_v14  ;;  %v384_v14 = vld [vmem:[%s2151_s4 + $0x8] sm:$0xff] }
  0x1e   :  { %1327 = vmatprep.subr.mxu0 %v63_v15 }
  0x1f   :  { %1328 = vmatpush3.msra.mxu0 %v63_v15  ;;  %v383_v15 = vld [vmem:[%s2151_s4] sm:$0xff] }
  0x20   :  { %1329 = vmatprep.subr.mxu0 %v62_v16 }
  0x21   :  { %1330 = vmatpush3.msra.mxu0 %v62_v16 }
  0x22   :  { %1332 = vmatmul.mubr.f32.vlgmr.msra.gmra.mxu0 %v47_v17  ;;  %1387 = vmatprep.subr.mxu0 %v398_v33  ;;  %v1144_v17 = vld [vmem:[%s2152_s3] ss:$0 sm:$0xff] }
  0x23   :  { %1334 = vmatprep.mubr.f32.mxu0 %v48_v18  ;;  %1388 = vmatpush3.msra.mxu0 %v398_v33 }
  0x24   :  { %1389 = vmatprep.subr.mxu0 %v397_v34 }
  0x25   :  { %1390 = vmatpush3.msra.mxu0 %v397_v34 }
  0x26   :  { %1335 = vmatmul.mubr.f32.gmra.mxu0 %v49_v19  ;;  %1391 = vmatprep.subr.mxu0 %v396_v35 }
  0x27   :  { %1337 = vmatprep.mubr.f32.mxu0 %v50_v20  ;;  %1392 = vmatpush3.msra.mxu0 %v396_v35 }
  0x28   :  { %1393 = vmatprep.subr.mxu0 %v395_v36 }
  0x29   :  { %1394 = vmatpush3.msra.mxu0 %v395_v36 }
  0x2a   :  { %1338 = vmatmul.mubr.f32.gmra.mxu0 %v51_v21  ;;  %1395 = vmatprep.subr.mxu0 %v394_v37 }
  0x2b   :  { %1340 = vmatprep.mubr.f32.mxu0 %v52_v22  ;;  %1396 = vmatpush3.msra.mxu0 %v394_v37 }
  0x2c   :  { %1397 = vmatprep.subr.mxu0 %v393_v38 }
  0x2d   :  { %1398 = vmatpush3.msra.mxu0 %v393_v38 }
  0x2e   :  { %1341 = vmatmul.mubr.f32.gmra.mxu0 %v53_v23  ;;  %1399 = vmatprep.subr.mxu0 %v392_v39 }
  0x2f   :  { %1343 = vmatprep.mubr.f32.mxu0 %v54_v24  ;;  %1400 = vmatpush3.msra.mxu0 %v392_v39 }
  0x30   :  { %1401 = vmatprep.subr.mxu0 %v391_v40 }
  0x31   :  { %1402 = vmatpush3.msra.mxu0 %v391_v40 }
  0x32   :  { %1344 = vmatmul.mubr.f32.gmra.mxu0 %v55_v25  ;;  %1403 = vmatprep.subr.mxu0 %v390_v41 }
  0x33   :  { %1346 = vmatprep.mubr.f32.mxu0 %v56_v26  ;;  %1404 = vmatpush3.msra.mxu0 %v390_v41 }
  0x34   :  { %1405 = vmatprep.subr.mxu0 %v389_v42 }
  0x35   :  { %1406 = vmatpush3.msra.mxu0 %v389_v42 }
  0x36   :  { %1347 = vmatmul.mubr.f32.gmra.mxu0 %v57_v27  ;;  %1407 = vmatprep.subr.mxu0 %v388_v43 }
  0x37   :  { %1349 = vmatprep.mubr.f32.mxu0 %v58_v28  ;;  %1408 = vmatpush3.msra.mxu0 %v388_v43 }
  0x38   :  { %1409 = vmatprep.subr.mxu0 %v387_v44 }
  0x39   :  { %1410 = vmatpush3.msra.mxu0 %v387_v44 }
  0x3a   :  { %1350 = vmatmul.mubr.f32.gmra.mxu0 %v59_v29  ;;  %1411 = vmatprep.subr.mxu0 %v386_v12 }
  0x3b   :  { %1352 = vmatprep.mubr.f32.mxu0 %v60_v30  ;;  %1412 = vmatpush3.msra.mxu0 %v386_v12 }
  0x3c   :  { %1413 = vmatprep.subr.mxu0 %v385_v13 }
  0x3d   :  { %1414 = vmatpush3.msra.mxu0 %v385_v13 }
  0x3e   :  { %1353 = vmatmul.mubr.f32.gmra.mxu0 %v61_v31  ;;  %1415 = vmatprep.subr.mxu0 %v384_v14 }
  0x3f   :  { %1416 = vmatpush3.msra.mxu0 %v384_v14 }
  0x40   :  { %1417 = vmatprep.subr.mxu0 %v383_v15 }
  0x41   :  { %1418 = vmatpush3.msra.mxu0 %v383_v15 }
  0xe2   :  { %v1333_v45 = vpop.f32.mrf.mxu0 }
  0xe4   :  { %v144_v46 = vpop.f32.mrf.mxu0 }
  0xe5   :  { %v223_v4 = vpack.c.bf16 %v1333_v45, %v144_v46 }
  0xe6   :  { %v1336_v47 = vpop.f32.mrf.mxu0 }
  0xe8   :  { %v154_v48 = vpop.f32.mrf.mxu0 }
  0xe9   :  { %v224_v3 = vpack.c.bf16 %v1336_v47, %v154_v48 }
  0xea   :  { %v1339_v49 = vpop.f32.mrf.mxu0 }
  0xec   :  { %v164_v50 = vpop.f32.mrf.mxu0 }
  0xed   :  { %v225_v2 = vpack.c.bf16 %v1339_v49, %v164_v50  ;;  %v671_v50 = vld [vmem:[%s2153_s6 + $0x78] sm:$0xff] }
  0xee   :  { %v1342_v51 = vpop.f32.mrf.mxu0  ;;  %1475 = vmatprep.subr.mxu0 %v671_v50 }
  0xf0   :  { %v174_v52 = vpop.f32.mrf.mxu0 }
  0xf1   :  { %v226_v1 = vpack.c.bf16 %v1342_v51, %v174_v52  ;;  %v670_v51 = vld [vmem:[%s2153_s6 + $0x70] sm:$0xff]  ;;  %v669_v52 = vld [vmem:[%s2153_s6 + $0x68] sm:$0xff] }
  0xf2   :  { %v1345_v53 = vpop.f32.mrf.mxu0 }
  0xf4   :  { %v184_v54 = vpop.f32.mrf.mxu0 }
  0xf5   :  { %v227_v0 = vpack.c.bf16 %v1345_v53, %v184_v54  ;;  %v668_v53 = vld [vmem:[%s2153_s6 + $0x60] sm:$0xff]  ;;  %v667_v54 = vld [vmem:[%s2153_s6 + $0x58] sm:$0xff] }
  0xf6   :  { %v1348_v55 = vpop.f32.mrf.mxu0 }
  0xf8   :  { %v194_v56 = vpop.f32.mrf.mxu0 }
  0xf9   :  { %v228_v63 = vpack.c.bf16 %v1348_v55, %v194_v56  ;;  %v666_v55 = vld [vmem:[%s2153_s6 + $0x50] sm:$0xff]  ;;  %v665_v56 = vld [vmem:[%s2153_s6 + $0x48] sm:$0xff] }
  0xfa   :  { %v1351_v57 = vpop.f32.mrf.mxu0 }
  0xfc   :  { %v204_v58 = vpop.f32.mrf.mxu0 }
  0xfd   :  { %v229_v62 = vpack.c.bf16 %v1351_v57, %v204_v58  ;;  %v664_v57 = vld [vmem:[%s2153_s6 + $0x40] sm:$0xff]  ;;  %v663_v58 = vld [vmem:[%s2153_s6 + $0x38] sm:$0xff] }
  0xfe   :  { %v1354_v59 = vpop.f32.mrf.mxu0 }
 0x100   :  { %v214_v60 = vpop.f32.mrf.mxu0 }
 0x101   :  { %v230_v61 = vpack.c.bf16 %v1354_v59, %v214_v60  ;;  %v662_v59 = vld [vmem:[%s2153_s6 + $0x30] sm:$0xff]  ;;  %v661_v60 = vld [vmem:[%s2153_s6 + $0x28] sm:$0xff] }
 0x103   :  { %1355 = vmatprep.subr.bf16.mxu1 %v230_v61 }
 0x104   :  { %1356 = vmatpush3.bf16.msra.mxu1 %v230_v61  ;;  %v660_v61 = vld [vmem:[%s2153_s6 + $0x20] sm:$0xff] }
 0x105   :  { %1357 = vmatprep.subr.bf16.mxu1 %v229_v62 }
 0x108   :  { %1358 = vmatpush3.bf16.msra.mxu1 %v229_v62 }
 0x109   :  { %1359 = vmatprep.subr.bf16.mxu1 %v228_v63 }
 0x10c   :  { %1360 = vmatpush3.bf16.msra.mxu1 %v228_v63 }
 0x10d   :  { %1361 = vmatprep.subr.bf16.mxu1 %v227_v0 }
 0x110   :  { %1362 = vmatpush3.bf16.msra.mxu1 %v227_v0 }
 0x111   :  { %1363 = vmatprep.subr.bf16.mxu1 %v226_v1 }
 0x114   :  { %1364 = vmatpush3.bf16.msra.mxu1 %v226_v1 }
 0x115   :  { %1365 = vmatprep.subr.bf16.mxu1 %v225_v2 }
 0x118   :  { %1366 = vmatpush3.bf16.msra.mxu1 %v225_v2 }
 0x119   :  { %1367 = vmatprep.subr.bf16.mxu1 %v224_v3 }
 0x11c   :  { %1368 = vmatpush3.bf16.msra.mxu1 %v224_v3 }
 0x11d   :  { %1369 = vmatprep.subr.bf16.mxu1 %v223_v4 }
 0x120   :  { %1370 = vmatpush3.bf16.msra.mxu1 %v223_v4 }
 0x123   :  { %1372 = vmatmul.mubr.bf16.vlgmr.msra.gmra.mxu1 %v1821_v5 }
 0x124   :  { %1375 = vmatprep.mubr.bf16.mxu1 %v1826_v6 }
 0x12b   :  { %1376 = vmatmul.mubr.bf16.gmra.mxu1 %v1833_v7 }
 0x12c   :  { %1379 = vmatprep.mubr.bf16.mxu1 %v1838_v8 }
 0x133   :  { %1380 = vmatmul.mubr.bf16.gmra.mxu1 %v1845_v9 }
 0x134   :  { %1383 = vmatprep.mubr.bf16.mxu1 %v1850_v10 }
 0x13b   :  { %1384 = vmatmul.mubr.bf16.gmra.mxu1 %v1857_v11 }
 0x13c   :  { %1459 = vmatprep.mubr.bf16.mxu1 %v1779_v32 }
 0x1e3   :  { %v1373_v16 = vpop.f32.mrf.mxu1 }
 0x1e4   :  { %v329_v23 = vadd.f32 %v1373_v16, %v1144_v17 }
 0x1e5   :  { %v320_v18 = vpop.f32.mrf.mxu1 }
 0x1e6   :  { %v321_v19 = vadd.f32 %v1144_v17, %v320_v18 }
 0x1e7   :  { %v1374_v20 = vpop.f32.mrf.mxu1 }
 0x1e8   :  { %1419 = vmatprep.mubr.f32.mxu0 %v321_v19  ;;  %v332_v26 = vadd.f32 %v1374_v20, %v1144_v17 }
 0x1e9   :  { %v323_v21 = vpop.f32.mrf.mxu1 }
 0x1ea   :  { %v324_v22 = vadd.f32 %v1144_v17, %v323_v21 }
 0x1eb   :  { %v1377_v24 = vpop.f32.mrf.mxu1 }
 0x1ec   :  { %1420 = vmatmul.mubr.f32.vlgmr.msra.gmra.mxu0 %v324_v22  ;;  %v345_v31 = vadd.f32 %v1377_v24, %v1144_v17 }
 0x1ed   :  { %v336_v25 = vpop.f32.mrf.mxu1  ;;  %1422 = vmatprep.mubr.f32.mxu0 %v329_v23  ;;  %1476 = vmatpush3.msra.mxu0 %v671_v50 }
 0x1ee   :  { %v337_v27 = vadd.f32 %v1144_v17, %v336_v25  ;;  %1477 = vmatprep.subr.mxu0 %v670_v51 }
 0x1ef   :  { %v1378_v28 = vpop.f32.mrf.mxu1  ;;  %1478 = vmatpush3.msra.mxu0 %v670_v51 }
 0x1f0   :  { %1423 = vmatmul.mubr.f32.gmra.mxu0 %v332_v26  ;;  %v348_v35 = vadd.f32 %v1378_v28, %v1144_v17  ;;  %1479 = vmatprep.subr.mxu0 %v669_v52 }
 0x1f1   :  { %v339_v29 = vpop.f32.mrf.mxu1  ;;  %1425 = vmatprep.mubr.f32.mxu0 %v337_v27  ;;  %1480 = vmatpush3.msra.mxu0 %v669_v52 }
 0x1f2   :  { %v340_v30 = vadd.f32 %v1144_v17, %v339_v29  ;;  %1481 = vmatprep.subr.mxu0 %v668_v53  ;;  %v659_v29 = vld [vmem:[%s2153_s6 + $0x18] sm:$0xff] }
 0x1f3   :  { %v1381_v33 = vpop.f32.mrf.mxu1  ;;  %1482 = vmatpush3.msra.mxu0 %v668_v53 }
 0x1f4   :  { %1426 = vmatmul.mubr.f32.gmra.mxu0 %v340_v30  ;;  %v361_v40 = vadd.f32 %v1381_v33, %v1144_v17  ;;  %1483 = vmatprep.subr.mxu0 %v667_v54  ;;  %v658_v30 = vld [vmem:[%s2153_s6 + $0x10] sm:$0xff] }
 0x1f5   :  { %v352_v34 = vpop.f32.mrf.mxu1  ;;  %1428 = vmatprep.mubr.f32.mxu0 %v345_v31  ;;  %1484 = vmatpush3.msra.mxu0 %v667_v54  ;;  %v657_v31 = vld [vmem:[%s2153_s6 + $0x8] sm:$0xff] }
 0x1f6   :  { %v353_v36 = vadd.f32 %v1144_v17, %v352_v34  ;;  %1485 = vmatprep.subr.mxu0 %v666_v55  ;;  %v1153_v34 = vld [vmem:[%s2154_s5] ss:$0 sm:$0xff] }
 0x1f7   :  { %v1382_v37 = vpop.f32.mrf.mxu1  ;;  %1486 = vmatpush3.msra.mxu0 %v666_v55 }
 0x1f8   :  { %1429 = vmatmul.mubr.f32.gmra.mxu0 %v348_v35  ;;  %v364_v43 = vadd.f32 %v1382_v37, %v1144_v17  ;;  %1487 = vmatprep.subr.mxu0 %v665_v56 }
 0x1f9   :  { %v355_v38 = vpop.f32.mrf.mxu1  ;;  %1431 = vmatprep.mubr.f32.mxu0 %v353_v36  ;;  %1488 = vmatpush3.msra.mxu0 %v665_v56 }
 0x1fa   :  { %v356_v39 = vadd.f32 %v1144_v17, %v355_v38  ;;  %1489 = vmatprep.subr.mxu0 %v664_v57 }
 0x1fb   :  { %v1385_v41 = vpop.f32.mrf.mxu1  ;;  %1490 = vmatpush3.msra.mxu0 %v664_v57 }
 0x1fc   :  { %1432 = vmatmul.mubr.f32.gmra.mxu0 %v356_v39  ;;  %v377_v48 = vadd.f32 %v1385_v41, %v1144_v17  ;;  %1491 = vmatprep.subr.mxu0 %v663_v58 }
 0x1fd   :  { %v368_v42 = vpop.f32.mrf.mxu1  ;;  %1434 = vmatprep.mubr.f32.mxu0 %v361_v40  ;;  %1492 = vmatpush3.msra.mxu0 %v663_v58 }
 0x1fe   :  { %v369_v44 = vadd.f32 %v1144_v17, %v368_v42  ;;  %1493 = vmatprep.subr.mxu0 %v662_v59 }
 0x1ff   :  { %v1386_v45 = vpop.f32.mrf.mxu1  ;;  %1494 = vmatpush3.msra.mxu0 %v662_v59 }
 0x200   :  { %1435 = vmatmul.mubr.f32.gmra.mxu0 %v364_v43  ;;  %v380_v49 = vadd.f32 %v1386_v45, %v1144_v17  ;;  %1495 = vmatprep.subr.mxu0 %v661_v60 }
 0x201   :  { %v371_v46 = vpop.f32.mrf.mxu1  ;;  %1437 = vmatprep.mubr.f32.mxu0 %v369_v44  ;;  %1496 = vmatpush3.msra.mxu0 %v661_v60 }
 0x202   :  { %v372_v47 = vadd.f32 %v1144_v17, %v371_v46  ;;  %1497 = vmatprep.subr.mxu0 %v660_v61 }
 0x203   :  { %1498 = vmatpush3.msra.mxu0 %v660_v61 }
 0x204   :  { %1438 = vmatmul.mubr.f32.gmra.mxu0 %v372_v47  ;;  %1499 = vmatprep.subr.mxu0 %v659_v29 }
 0x205   :  { %1440 = vmatprep.mubr.f32.mxu0 %v377_v48  ;;  %1500 = vmatpush3.msra.mxu0 %v659_v29 }
 0x206   :  { %1501 = vmatprep.subr.mxu0 %v658_v30 }
 0x207   :  { %1502 = vmatpush3.msra.mxu0 %v658_v30 }
 0x208   :  { %1441 = vmatmul.mubr.f32.gmra.mxu0 %v380_v49  ;;  %1503 = vmatprep.subr.mxu0 %v657_v31 }
 0x209   :  { %1504 = vmatpush3.msra.mxu0 %v657_v31 }
 0x2ac   :  { %v1421_v62 = vpop.f32.mrf.mxu0 }
 0x2ae   :  { %v465_v63 = vpop.f32.mrf.mxu0 }
 0x2af   :  { %v544_v28 = vpack.c.bf16 %v1421_v62, %v465_v63 }
 0x2b0   :  { %v1424_v0 = vpop.f32.mrf.mxu0 }
 0x2b2   :  { %v475_v1 = vpop.f32.mrf.mxu0 }
 0x2b3   :  { %v545_v27 = vpack.c.bf16 %v1424_v0, %v475_v1 }
 0x2b4   :  { %v1427_v2 = vpop.f32.mrf.mxu0 }
 0x2b6   :  { %v485_v3 = vpop.f32.mrf.mxu0 }
 0x2b7   :  { %v546_v26 = vpack.c.bf16 %v1427_v2, %v485_v3 }
 0x2b8   :  { %v1430_v4 = vpop.f32.mrf.mxu0 }
 0x2ba   :  { %v495_v12 = vpop.f32.mrf.mxu0 }
 0x2bb   :  { %v547_v25 = vpack.c.bf16 %v1430_v4, %v495_v12 }
 0x2bc   :  { %v1433_v13 = vpop.f32.mrf.mxu0 }
 0x2be   :  { %v505_v14 = vpop.f32.mrf.mxu0 }
 0x2bf   :  { %v548_v24 = vpack.c.bf16 %v1433_v13, %v505_v14 }
 0x2c0   :  { %v1436_v15 = vpop.f32.mrf.mxu0 }
 0x2c2   :  { %v515_v16 = vpop.f32.mrf.mxu0 }
 0x2c3   :  { %v549_v23 = vpack.c.bf16 %v1436_v15, %v515_v16 }
 0x2c4   :  { %v1439_v17 = vpop.f32.mrf.mxu0 }
 0x2c6   :  { %v525_v18 = vpop.f32.mrf.mxu0 }
 0x2c7   :  { %v550_v22 = vpack.c.bf16 %v1439_v17, %v525_v18 }
 0x2c8   :  { %v1442_v19 = vpop.f32.mrf.mxu0 }
 0x2ca   :  { %v535_v20 = vpop.f32.mrf.mxu0 }
 0x2cb   :  { %v551_v21 = vpack.c.bf16 %v1442_v19, %v535_v20 }
 0x2cd   :  { %1443 = vmatprep.subr.bf16.mxu1 %v551_v21 }
 0x2ce   :  { %1444 = vmatpush3.bf16.msra.mxu1 %v551_v21 }
 0x2cf   :  { %1445 = vmatprep.subr.bf16.mxu1 %v550_v22 }
 0x2d2   :  { %1446 = vmatpush3.bf16.msra.mxu1 %v550_v22 }
 0x2d3   :  { %1447 = vmatprep.subr.bf16.mxu1 %v549_v23 }
 0x2d6   :  { %1448 = vmatpush3.bf16.msra.mxu1 %v549_v23 }
 0x2d7   :  { %1449 = vmatprep.subr.bf16.mxu1 %v548_v24 }
 0x2da   :  { %1450 = vmatpush3.bf16.msra.mxu1 %v548_v24 }
 0x2db   :  { %1451 = vmatprep.subr.bf16.mxu1 %v547_v25 }
 0x2de   :  { %1452 = vmatpush3.bf16.msra.mxu1 %v547_v25 }
 0x2df   :  { %1453 = vmatprep.subr.bf16.mxu1 %v546_v26 }
 0x2e2   :  { %1454 = vmatpush3.bf16.msra.mxu1 %v546_v26 }
 0x2e3   :  { %1455 = vmatprep.subr.bf16.mxu1 %v545_v27 }
 0x2e6   :  { %1456 = vmatpush3.bf16.msra.mxu1 %v545_v27 }
 0x2e7   :  { %1457 = vmatprep.subr.bf16.mxu1 %v544_v28 }
 0x2ea   :  { %1458 = vmatpush3.bf16.msra.mxu1 %v544_v28 }
 0x2ed   :  { %1460 = vmatmul.mubr.bf16.vlgmr.msra.gmra.mxu1 %v1821_v5 }
 0x2ee   :  { %1463 = vmatprep.mubr.bf16.mxu1 %v1826_v6 }
 0x2f5   :  { %1464 = vmatmul.mubr.bf16.gmra.mxu1 %v1833_v7 }
 0x2f6   :  { %1467 = vmatprep.mubr.bf16.mxu1 %v1838_v8 }
 0x2fd   :  { %1468 = vmatmul.mubr.bf16.gmra.mxu1 %v1845_v9 }
 0x2fe   :  { %1471 = vmatprep.mubr.bf16.mxu1 %v1850_v10 }
 0x305   :  { %1472 = vmatmul.mubr.bf16.gmra.mxu1 %v1857_v11 }
 0x306   :  { %1547 = vmatprep.mubr.bf16.mxu1 %v1779_v32  ;;  %v656_v32 = vld [vmem:[%s2153_s6] sm:$0xff] }
 0x307   :  { %1505 = vmatprep.subr.mxu0 %v656_v32 }
 0x308   :  { %1506 = vmatpush3.msra.mxu0 %v656_v32 }
 0x3ad   :  { %v1461_v33 = vpop.f32.mrf.mxu1 }
 0x3ae   :  { %v602_v40 = vadd.f32 %v1461_v33, %v1153_v34  ;;  %v929_v33 = vlaneseq }
 0x3af   :  { %v593_v35 = vpop.f32.mrf.mxu1 }
 0x3b0   :  { %v594_v36 = vadd.f32 %v1153_v34, %v593_v35  ;;  %v1154_v35 = vld [vmem:[%s2155_s7] ss:$0 sm:$0xff] }
 0x3b1   :  { %v1462_v37 = vpop.f32.mrf.mxu1 }
 0x3b2   :  { %1507 = vmatprep.mubr.f32.mxu0 %v594_v36  ;;  %v605_v43 = vadd.f32 %v1462_v37, %v1153_v34 }
 0x3b3   :  { %v596_v38 = vpop.f32.mrf.mxu1 }
 0x3b4   :  { %v597_v39 = vadd.f32 %v1153_v34, %v596_v38 }
 0x3b5   :  { %v1465_v41 = vpop.f32.mrf.mxu1 }
 0x3b6   :  { %1508 = vmatmul.mubr.f32.vlgmr.msra.gmra.mxu0 %v597_v39  ;;  %v618_v48 = vadd.f32 %v1465_v41, %v1153_v34 }
 0x3b7   :  { %v609_v42 = vpop.f32.mrf.mxu1  ;;  %1510 = vmatprep.mubr.f32.mxu0 %v602_v40 }
 0x3b8   :  { %v610_v44 = vadd.f32 %v1153_v34, %v609_v42 }
 0x3b9   :  { %v1466_v45 = vpop.f32.mrf.mxu1 }
 0x3ba   :  { %1511 = vmatmul.mubr.f32.gmra.mxu0 %v605_v43  ;;  %v621_v51 = vadd.f32 %v1466_v45, %v1153_v34 }
 0x3bb   :  { %v612_v46 = vpop.f32.mrf.mxu1  ;;  %1513 = vmatprep.mubr.f32.mxu0 %v610_v44 }
 0x3bc   :  { %v613_v47 = vadd.f32 %v1153_v34, %v612_v46 }
 0x3bd   :  { %v1469_v49 = vpop.f32.mrf.mxu1 }
 0x3be   :  { %1514 = vmatmul.mubr.f32.gmra.mxu0 %v613_v47  ;;  %v634_v56 = vadd.f32 %v1469_v49, %v1153_v34 }
 0x3bf   :  { %v625_v50 = vpop.f32.mrf.mxu1  ;;  %1516 = vmatprep.mubr.f32.mxu0 %v618_v48 }
 0x3c0   :  { %v626_v52 = vadd.f32 %v1153_v34, %v625_v50 }
 0x3c1   :  { %v1470_v53 = vpop.f32.mrf.mxu1 }
 0x3c2   :  { %1517 = vmatmul.mubr.f32.gmra.mxu0 %v621_v51  ;;  %v637_v59 = vadd.f32 %v1470_v53, %v1153_v34 }
 0x3c3   :  { %v628_v54 = vpop.f32.mrf.mxu1  ;;  %1519 = vmatprep.mubr.f32.mxu0 %v626_v52 }
 0x3c4   :  { %v629_v55 = vadd.f32 %v1153_v34, %v628_v54 }
 0x3c5   :  { %v1473_v57 = vpop.f32.mrf.mxu1 }
 0x3c6   :  { %1520 = vmatmul.mubr.f32.gmra.mxu0 %v629_v55  ;;  %v650_v0 = vadd.f32 %v1473_v57, %v1153_v34 }
 0x3c7   :  { %v641_v58 = vpop.f32.mrf.mxu1  ;;  %1522 = vmatprep.mubr.f32.mxu0 %v634_v56 }
 0x3c8   :  { %v642_v60 = vadd.f32 %v1153_v34, %v641_v58 }
 0x3c9   :  { %v1474_v61 = vpop.f32.mrf.mxu1 }
 0x3ca   :  { %1523 = vmatmul.mubr.f32.gmra.mxu0 %v637_v59  ;;  %v653_v1 = vadd.f32 %v1474_v61, %v1153_v34 }
 0x3cb   :  { %v644_v62 = vpop.f32.mrf.mxu1  ;;  %1525 = vmatprep.mubr.f32.mxu0 %v642_v60 }
 0x3cc   :  { %v645_v63 = vadd.f32 %v1153_v34, %v644_v62  ;;  %v1942_v34 = vand.u32 127, %v929_v33 }
 0x3ce   :  { %1526 = vmatmul.mubr.f32.gmra.mxu0 %v645_v63  ;;  %vm931_vm0 = vcmp.lt.s32.totalorder %v1942_v34, 8 }
 0x3cf   :  { %1528 = vmatprep.mubr.f32.mxu0 %v650_v0 }
 0x3d2   :  { %1529 = vmatmul.mubr.f32.gmra.mxu0 %v653_v1 }
 0x476   :  { %v1509_v2 = vpop.f32.mrf.mxu0 }
 0x478   :  { %v738_v3 = vpop.f32.mrf.mxu0 }
 0x479   :  { %v817_v32 = vpack.c.bf16 %v1509_v2, %v738_v3 }
 0x47a   :  { %v1512_v4 = vpop.f32.mrf.mxu0 }
 0x47c   :  { %v748_v12 = vpop.f32.mrf.mxu0 }
 0x47d   :  { %v818_v31 = vpack.c.bf16 %v1512_v4, %v748_v12 }
 0x47e   :  { %v1515_v13 = vpop.f32.mrf.mxu0 }
 0x480   :  { %v758_v14 = vpop.f32.mrf.mxu0 }
 0x481   :  { %v819_v30 = vpack.c.bf16 %v1515_v13, %v758_v14 }
 0x482   :  { %v1518_v15 = vpop.f32.mrf.mxu0 }
 0x484   :  { %v768_v16 = vpop.f32.mrf.mxu0 }
 0x485   :  { %v820_v29 = vpack.c.bf16 %v1518_v15, %v768_v16 }
 0x486   :  { %v1521_v17 = vpop.f32.mrf.mxu0 }
 0x488   :  { %v778_v18 = vpop.f32.mrf.mxu0 }
 0x489   :  { %v821_v28 = vpack.c.bf16 %v1521_v17, %v778_v18 }
 0x48a   :  { %v1524_v19 = vpop.f32.mrf.mxu0 }
 0x48c   :  { %v788_v20 = vpop.f32.mrf.mxu0 }
 0x48d   :  { %v822_v27 = vpack.c.bf16 %v1524_v19, %v788_v20 }
 0x48e   :  { %v1527_v21 = vpop.f32.mrf.mxu0 }
 0x490   :  { %v798_v22 = vpop.f32.mrf.mxu0 }
 0x491   :  { %v823_v26 = vpack.c.bf16 %v1527_v21, %v798_v22 }
 0x492   :  { %v1530_v23 = vpop.f32.mrf.mxu0 }
 0x494   :  { %v808_v24 = vpop.f32.mrf.mxu0 }
 0x495   :  { %v824_v25 = vpack.c.bf16 %v1530_v23, %v808_v24 }
 0x497   :  { %1531 = vmatprep.subr.bf16.mxu1 %v824_v25 }
 0x498   :  { %1532 = vmatpush3.bf16.msra.mxu1 %v824_v25 }
 0x499   :  { %1533 = vmatprep.subr.bf16.mxu1 %v823_v26 }
 0x49c   :  { %1534 = vmatpush3.bf16.msra.mxu1 %v823_v26 }
 0x49d   :  { %1535 = vmatprep.subr.bf16.mxu1 %v822_v27 }
 0x4a0   :  { %1536 = vmatpush3.bf16.msra.mxu1 %v822_v27 }
 0x4a1   :  { %1537 = vmatprep.subr.bf16.mxu1 %v821_v28 }
 0x4a4   :  { %1538 = vmatpush3.bf16.msra.mxu1 %v821_v28 }
 0x4a5   :  { %1539 = vmatprep.subr.bf16.mxu1 %v820_v29 }
 0x4a8   :  { %1540 = vmatpush3.bf16.msra.mxu1 %v820_v29 }
 0x4a9   :  { %1541 = vmatprep.subr.bf16.mxu1 %v819_v30 }
 0x4ac   :  { %1542 = vmatpush3.bf16.msra.mxu1 %v819_v30 }
 0x4ad   :  { %1543 = vmatprep.subr.bf16.mxu1 %v818_v31 }
 0x4b0   :  { %1544 = vmatpush3.bf16.msra.mxu1 %v818_v31 }
 0x4b1   :  { %1545 = vmatprep.subr.bf16.mxu1 %v817_v32 }
 0x4b4   :  { %1546 = vmatpush3.bf16.msra.mxu1 %v817_v32 }
 0x4b7   :  { %1548 = vmatmul.mubr.bf16.vlgmr.msra.gmra.mxu1 %v1821_v5 }
 0x4b8   :  { %1551 = vmatprep.mubr.bf16.mxu1 %v1826_v6 }
 0x4bf   :  { %1552 = vmatmul.mubr.bf16.gmra.mxu1 %v1833_v7 }
 0x4c0   :  { %1555 = vmatprep.mubr.bf16.mxu1 %v1838_v8 }
 0x4c7   :  { %1556 = vmatmul.mubr.bf16.gmra.mxu1 %v1845_v9 }
 0x4c8   :  { %1559 = vmatprep.mubr.bf16.mxu1 %v1850_v10 }
 0x4cf   :  { %1560 = vmatmul.mubr.bf16.gmra.mxu1 %v1857_v11 }
 0x577   :  { %v1549_v5 = vpop.f32.mrf.mxu1 }
 0x578   :  { %v875_v6 = vadd.f32 %v1549_v5, %v1154_v35 }
 0x579   :  { %v866_v7 = vpop.f32.mrf.mxu1 }
 0x57a   :  { %v867_v36 = vadd.f32 %v1154_v35, %v866_v7  ;;  %v934_v8 = vsel %vm931_vm0, %v875_v6, -1e+30 }
 0x57b   :  { %952 = vmax.xlane.f32.xlu1 %v934_v8  ;;  %v1550_v9 = vpop.f32.mrf.mxu1 }
 0x57c   :  { %v878_v10 = vadd.f32 %v1550_v9, %v1154_v35  ;;  %v932_v11 = vsel %vm931_vm0, %v867_v36, -1e+30 }
 0x57d   :  { %v869_v37 = vpop.f32.mrf.mxu1  ;;  %948 = vmax.xlane.f32.xlu0 %v932_v11 }
 0x57e   :  { %v870_v38 = vadd.f32 %v1154_v35, %v869_v37  ;;  %v935_v39 = vsel %vm931_vm0, %v878_v10, -1e+30 }
 0x57f   :  { %954 = vmax.xlane.f32.xlu1 %v935_v39  ;;  %v1553_v40 = vpop.f32.mrf.mxu1 }
 0x580   :  { %v891_v41 = vadd.f32 %v1553_v40, %v1154_v35  ;;  %v933_v42 = vsel %vm931_vm0, %v870_v38, -1e+30 }
 0x581   :  { %v882_v43 = vpop.f32.mrf.mxu1  ;;  %950 = vmax.xlane.f32.xlu0 %v933_v42 }
 0x582   :  { %v883_v45 = vadd.f32 %v1154_v35, %v882_v43  ;;  %v938_v47 = vsel %vm931_vm0, %v891_v41, -1e+30 }
 0x583   :  { %v1554_v44 = vpop.f32.mrf.mxu1 }
 0x584   :  { %v894_v46 = vadd.f32 %v1554_v44, %v1154_v35  ;;  %v936_v53 = vsel %vm931_vm0, %v883_v45, -1e+30 }
 0x585   :  { %v885_v48 = vpop.f32.mrf.mxu1  ;;  %960 = vmax.xlane.f32.xlu0 %v938_v47 }
 0x586   :  { %v886_v49 = vadd.f32 %v1154_v35, %v885_v48  ;;  %v939_v50 = vsel %vm931_vm0, %v894_v46, -1e+30 }
 0x587   :  { %962 = vmax.xlane.f32.xlu1 %v939_v50  ;;  %v1557_v51 = vpop.f32.mrf.mxu1 }
 0x588   :  { %v907_v52 = vadd.f32 %v1557_v51, %v1154_v35  ;;  %v937_v55 = vsel %vm931_vm0, %v886_v49, -1e+30 }
 0x589   :  { %v898_v54 = vpop.f32.mrf.mxu1  ;;  %956 = vmax.xlane.f32.xlu0 %v936_v53 }
 0x58a   :  { %v899_v57 = vadd.f32 %v1154_v35, %v898_v54  ;;  %v942_v59 = vsel %vm931_vm0, %v907_v52, -1e+30 }
 0x58b   :  { %v1558_v56 = vpop.f32.mrf.mxu1  ;;  %958 = vmax.xlane.f32.xlu1 %v937_v55 }
 0x58c   :  { %v910_v58 = vadd.f32 %v1558_v56, %v1154_v35  ;;  %v1970_v0 = vsel %vm931_vm0, %v899_v57, -1e+30 }
 0x58d   :  { %v901_v60 = vpop.f32.mrf.mxu1  ;;  %968 = vmax.xlane.f32.xlu0 %v942_v59 }
 0x58e   :  { %v902_v61 = vadd.f32 %v1154_v35, %v901_v60  ;;  %v943_v62 = vsel %vm931_vm0, %v910_v58, -1e+30 }
 0x58f   :  { %v1561_v63 = vpop.f32.mrf.mxu1  ;;  %970 = vmax.xlane.f32.xlu1 %v943_v62 }
 0x590   :  { %v1975_v3 = vsel %vm931_vm0, %v902_v61, -1e+30  ;;  %v923_v12 = vadd.f32 %v1561_v63, %v1154_v35 }
 0x591   :  { %v914_v1 = vpop.f32.mrf.mxu1  ;;  %964 = vmax.xlane.f32.xlu0 %v1970_v0 }
 0x592   :  { %v915_v2 = vadd.f32 %v1154_v35, %v914_v1  ;;  %v1989_v18 = vsel %vm931_vm0, %v923_v12, -1e+30 }
 0x593   :  { %v1562_v4 = vpop.f32.mrf.mxu1  ;;  %966 = vmax.xlane.f32.xlu1 %v1975_v3 }
 0x594   :  { %v1980_v13 = vsel %vm931_vm0, %v915_v2, -1e+30  ;;  %v926_v16 = vadd.f32 %v1562_v4, %v1154_v35 }
 0x595   :  { %v917_v14 = vpop.f32.mrf.mxu1  ;;  %972 = vmax.xlane.f32.xlu0 %v1980_v13 }
 0x596   :  { %v918_v15 = vadd.f32 %v1154_v35, %v917_v14  ;;  %v1995_v19 = vsel %vm931_vm0, %v926_v16, -1e+30 }
 0x598   :  { %v1985_v17 = vsel %vm931_vm0, %v918_v15, -1e+30 }
 0x599   :  { %974 = vmax.xlane.f32.xlu1 %v1985_v17  ;;  %976 = vmax.xlane.f32.xlu0 %v1989_v18 }
 0x59d   :  { %978 = vmax.xlane.f32.xlu1 %v1995_v19 }
 0x604   :  { %v953_v20 = vpop.xlane.xlu1 %952 }
 0x605   :  { %v1998_v21 = vsub.f32 %v934_v8, %v953_v20 }
 0x606   :  { %v949_v22 = vpop.xlane.xlu0 %948 }
 0x607   :  { %v1000_v23 = vmul.f32 1.442695, %v1998_v21  ;;  %v2001_v24 = vsub.f32 %v932_v11, %v949_v22 }
 0x608   :  { %v955_v25 = vpop.xlane.xlu1 %954 }
 0x609   :  { %1571 = vpow2.f32 %v1000_v23  ;;  %v996_v26 = vmul.f32 1.442695, %v2001_v24  ;;  %v2004_v27 = vsub.f32 %v935_v39, %v955_v25 }
 0x60a   :  { %v951_v28 = vpop.xlane.xlu0 %950 }
 0x60b   :  { %1573 = vpow2.f32 %v996_v26  ;;  %v1002_v29 = vmul.f32 1.442695, %v2004_v27  ;;  %v2007_v30 = vsub.f32 %v933_v42, %v951_v28 }
 0x60d   :  { %1575 = vpow2.f32 %v1002_v29  ;;  %v998_v31 = vmul.f32 1.442695, %v2007_v30 }
 0x60e   :  { %v961_v32 = vpop.xlane.xlu0 %960 }
 0x60f   :  { %1577 = vpow2.f32 %v998_v31  ;;  %v2010_v33 = vsub.f32 %v938_v47, %v961_v32 }
 0x610   :  { %v963_v35 = vpop.xlane.xlu1 %962 }
 0x611   :  { %v1008_v5 = vmul.f32 1.442695, %v2010_v33  ;;  %v2013_v6 = vsub.f32 %v939_v50, %v963_v35 }
 0x612   :  { %v957_v7 = vpop.xlane.xlu0 %956 }
 0x613   :  { %1579 = vpow2.f32 %v1008_v5  ;;  %v1010_v36 = vmul.f32 1.442695, %v2013_v6  ;;  %v2016_v8 = vsub.f32 %v936_v53, %v957_v7 }
 0x614   :  { %v959_v9 = vpop.xlane.xlu1 %958 }
 0x615   :  { %1581 = vpow2.f32 %v1010_v36  ;;  %v1004_v10 = vmul.f32 1.442695, %v2016_v8  ;;  %v2019_v11 = vsub.f32 %v937_v55, %v959_v9 }
 0x616   :  { %v1572_v37 = vpop.eup %1571  ;;  %v969_v38 = vpop.xlane.xlu0 %968 }
 0x617   :  { %1583 = vpow2.f32 %v1004_v10  ;;  %v1006_v39 = vmul.f32 1.442695, %v2019_v11  ;;  %v2022_v40 = vsub.f32 %v942_v59, %v969_v38  ;;  %v1030_v41 = vsel %vm931_vm0, %v1572_v37, 0.0 }
 0x618   :  { %v1574_v42 = vpop.eup %1573  ;;  %v971_v43 = vpop.xlane.xlu1 %970  ;;  %1048 = vadd.xlane.f32.xlu0 %v1030_v41 }
 0x619   :  { %1585 = vpow2.f32 %v1006_v39  ;;  %v1016_v44 = vmul.f32 1.442695, %v2022_v40  ;;  %v2027_v45 = vsub.f32 %v943_v62, %v971_v43  ;;  %v1028_v48 = vsel %vm931_vm0, %v1574_v42, 0.0 }
 0x61a   :  { %v1576_v46 = vpop.eup %1575  ;;  %v965_v47 = vpop.xlane.xlu0 %964 }
 0x61b   :  { %1587 = vpow2.f32 %v1016_v44  ;;  %v1018_v49 = vmul.f32 1.442695, %v2027_v45  ;;  %v2033_v50 = vsub.f32 %v1970_v0, %v965_v47  ;;  %v1031_v51 = vsel %vm931_vm0, %v1576_v46, 0.0 }
 0x61c   :  { %v1578_v52 = vpop.eup %1577  ;;  %1050 = vadd.xlane.f32.xlu1 %v1031_v51  ;;  %v967_v53 = vpop.xlane.xlu1 %966  ;;  %1044 = vadd.xlane.f32.xlu0 %v1028_v48 }
 0x61d   :  { %1589 = vpow2.f32 %v1018_v49  ;;  %v1012_v54 = vmul.f32 1.442695, %v2033_v50  ;;  %v2039_v55 = vsub.f32 %v1975_v3, %v967_v53  ;;  %v1029_v59 = vsel %vm931_vm0, %v1578_v52, 0.0 }
 0x61e   :  { %v973_v56 = vpop.xlane.xlu0 %972 }
 0x61f   :  { %1591 = vpow2.f32 %v1012_v54  ;;  %v1014_v57 = vmul.f32 1.442695, %v2039_v55  ;;  %v2043_v58 = vsub.f32 %v1980_v13, %v973_v56 }
 0x620   :  { %v1580_v60 = vpop.eup %1579  ;;  %1046 = vadd.xlane.f32.xlu1 %v1029_v59 }
 0x621   :  { %1593 = vpow2.f32 %v1014_v57  ;;  %v1020_v61 = vmul.f32 1.442695, %v2043_v58  ;;  %v1034_v62 = vsel %vm931_vm0, %v1580_v60, 0.0 }
 0x622   :  { %v1582_v63 = vpop.eup %1581  ;;  %v975_v0 = vpop.xlane.xlu1 %974  ;;  %1056 = vadd.xlane.f32.xlu0 %v1034_v62 }
 0x623   :  { %v977_v1 = vpop.xlane.xlu0 %976  ;;  %1595 = vpow2.f32 %v1020_v61  ;;  %v2051_v2 = vsub.f32 %v1985_v17, %v975_v0  ;;  %v1035_v4 = vsel %vm931_vm0, %v1582_v63, 0.0 }
 0x624   :  { %v2054_v3 = vsub.f32 %v1989_v18, %v977_v1  ;;  %v1584_v12 = vpop.eup %1583  ;;  %1058 = vadd.xlane.f32.xlu1 %v1035_v4 }
 0x625   :  { %v1022_v13 = vmul.f32 1.442695, %v2051_v2  ;;  %v1032_v15 = vsel %vm931_vm0, %v1584_v12, 0.0 }
 0x626   :  { %v1024_v14 = vmul.f32 1.442695, %v2054_v3  ;;  %v1586_v16 = vpop.eup %1585  ;;  %v979_v20 = vpop.xlane.xlu1 %978  ;;  %1052 = vadd.xlane.f32.xlu0 %v1032_v15 }
 0x627   :  { %1597 = vpow2.f32 %v1022_v13  ;;  %v2063_v17 = vsub.f32 %v1995_v19, %v979_v20  ;;  %v1033_v18 = vsel %vm931_vm0, %v1586_v16, 0.0 }
 0x628   :  { %v1588_v22 = vpop.eup %1587  ;;  %1599 = vpow2.f32 %v1024_v14  ;;  %1054 = vadd.xlane.f32.xlu1 %v1033_v18 }
 0x629   :  { %v1026_v23 = vmul.f32 1.442695, %v2063_v17  ;;  %v1038_v25 = vsel %vm931_vm0, %v1588_v22, 0.0 }
 0x62a   :  { %v1590_v26 = vpop.eup %1589  ;;  %1064 = vadd.xlane.f32.xlu0 %v1038_v25 }
 0x62b   :  { %1601 = vpow2.f32 %v1026_v23  ;;  %v1039_v28 = vsel %vm931_vm0, %v1590_v26, 0.0 }
 0x62c   :  { %v1592_v29 = vpop.eup %1591  ;;  %1066 = vadd.xlane.f32.xlu1 %v1039_v28 }
 0x62d   :  { %v1036_v19 = vsel %vm931_vm0, %v1592_v29, 0.0 }
 0x62e   :  { %v1594_v31 = vpop.eup %1593  ;;  %1060 = vadd.xlane.f32.xlu0 %v1036_v19 }
 0x62f   :  { %v1037_v32 = vsel %vm931_vm0, %v1594_v31, 0.0 }
 0x630   :  { %v1596_v35 = vpop.eup %1595  ;;  %1062 = vadd.xlane.f32.xlu1 %v1037_v32 }
 0x631   :  { %v1040_v5 = vsel %vm931_vm0, %v1596_v35, 0.0 }
 0x632   :  { %1068 = vadd.xlane.f32.xlu0 %v1040_v5 }
 0x634   :  { %v1598_v7 = vpop.eup %1597 }
 0x635   :  { %v1600_v36 = vpop.eup %1599  ;;  %v1041_v9 = vsel %vm931_vm0, %v1598_v7, 0.0 }
 0x636   :  { %1070 = vadd.xlane.f32.xlu1 %v1041_v9  ;;  %v1042_v10 = vsel %vm931_vm0, %v1600_v36, 0.0 }
 0x637   :  { %1072 = vadd.xlane.f32.xlu0 %v1042_v10 }
 0x638   :  { %v1602_v37 = vpop.eup %1601 }
 0x639   :  { %v1043_v38 = vsel %vm931_vm0, %v1602_v37, 0.0 }
 0x63a   :  { %1074 = vadd.xlane.f32.xlu1 %v1043_v38 }
 0x6a1   :  { %v1049_v39 = vpop.xlane.xlu0 %1048 }
 0x6a2   :  { %1603 = vlog2.f32 %v1049_v39 }
 0x6a5   :  { %v1051_v41 = vpop.xlane.xlu1 %1050  ;;  %v1045_v42 = vpop.xlane.xlu0 %1044 }
 0x6a6   :  { %1605 = vlog2.f32 %v1051_v41 }
 0x6a7   :  { %1607 = vlog2.f32 %v1045_v42 }
 0x6a9   :  { %v1047_v43 = vpop.xlane.xlu1 %1046 }
 0x6aa   :  { %1609 = vlog2.f32 %v1047_v43 }
 0x6ab   :  { %v1057_v44 = vpop.xlane.xlu0 %1056 }
 0x6ac   :  { %1611 = vlog2.f32 %v1057_v44 }
 0x6ad   :  { %v1059_v46 = vpop.xlane.xlu1 %1058 }
 0x6ae   :  { %1613 = vlog2.f32 %v1059_v46 }
 0x6af   :  { %v1604_v47 = vpop.eup %1603  ;;  %v1053_v48 = vpop.xlane.xlu0 %1052 }
 0x6b0   :  { %v1081_v49 = vmul.f32 0.6931472, %v1604_v47  ;;  %1615 = vlog2.f32 %v1053_v48 }
 0x6b1   :  { %v1055_v51 = vpop.xlane.xlu1 %1054 }
 0x6b2   :  { %v1110_v34 = vsub.f32 %v1998_v21, %v1081_v49  ;;  %1617 = vlog2.f32 %v1055_v51 }
 0x6b3   :  { %v1606_v52 = vpop.eup %1605  ;;  %v1065_v53 = vpop.xlane.xlu0 %1064 }
 0x6b4   :  { %v1608_v54 = vpop.eup %1607  ;;  %1126 = vst [vmem:[%s2156_s8 + $0x10] sm:$0xff] %v1110_v34  ;;  %v1083_v56 = vmul.f32 0.6931472, %v1606_v52  ;;  %1619 = vlog2.f32 %v1065_v53 }
 0x6b5   :  { %v1077_v57 = vmul.f32 0.6931472, %v1608_v54  ;;  %v1067_v59 = vpop.xlane.xlu1 %1066 }
 0x6b6   :  { %v1111_v60 = vsub.f32 %v2004_v27, %v1083_v56  ;;  %1621 = vlog2.f32 %v1067_v59 }
 0x6b7   :  { %v1610_v61 = vpop.eup %1609  ;;  %v1108_v62 = vsub.f32 %v2001_v24, %v1077_v57  ;;  %v1061_v63 = vpop.xlane.xlu0 %1060 }
 0x6b8   :  { %1127 = vst [vmem:[%s2156_s8 + $0x18] sm:$0xff] %v1111_v60  ;;  %v1079_v21 = vmul.f32 0.6931472, %v1610_v61  ;;  %1623 = vlog2.f32 %v1061_v63 }
 0x6b9   :  { %v1612_v0 = vpop.eup %1611  ;;  %1124 = vst [vmem:[%s2156_s8] sm:$0xff] %v1108_v62  ;;  %v1063_v1 = vpop.xlane.xlu1 %1062 }
 0x6ba   :  { %v1109_v4 = vsub.f32 %v2007_v30, %v1079_v21  ;;  %v1089_v27 = vmul.f32 0.6931472, %v1612_v0  ;;  %1625 = vlog2.f32 %v1063_v1 }
 0x6bb   :  { %v1614_v12 = vpop.eup %1613  ;;  %v1069_v13 = vpop.xlane.xlu0 %1068 }
 0x6bc   :  { %1125 = vst [vmem:[%s2156_s8 + $0x8] sm:$0xff] %v1109_v4  ;;  %v1114_v24 = vsub.f32 %v2010_v33, %v1089_v27  ;;  %v1091_v14 = vmul.f32 0.6931472, %v1614_v12  ;;  %1627 = vlog2.f32 %v1069_v13 }
 0x6bd   :  { %v1616_v15 = vpop.eup %1615 }
 0x6be   :  { %1130 = vst [vmem:[%s2156_s8 + $0x30] sm:$0xff] %v1114_v24  ;;  %v1115_v16 = vsub.f32 %v2013_v6, %v1091_v14  ;;  %v1085_v30 = vmul.f32 0.6931472, %v1616_v15 }
 0x6bf   :  { %v1618_v20 = vpop.eup %1617  ;;  %v1071_v18 = vpop.xlane.xlu1 %1070 }
 0x6c0   :  { %1131 = vst [vmem:[%s2156_s8 + $0x38] sm:$0xff] %v1115_v16  ;;  %v1112_v22 = vsub.f32 %v2016_v8, %v1085_v30  ;;  %v1087_v23 = vmul.f32 0.6931472, %v1618_v20  ;;  %1629 = vlog2.f32 %v1071_v18  ;;  %v1073_v33 = vpop.xlane.xlu0 %1072 }
 0x6c1   :  { %v1620_v25 = vpop.eup %1619  ;;  %1631 = vlog2.f32 %v1073_v33 }
 0x6c2   :  { %1128 = vst [vmem:[%s2156_s8 + $0x20] sm:$0xff] %v1112_v22  ;;  %v1113_v6 = vsub.f32 %v2019_v11, %v1087_v23  ;;  %v1097_v26 = vmul.f32 0.6931472, %v1620_v25 }
 0x6c3   :  { %v1622_v28 = vpop.eup %1621  ;;  %v1075_v29 = vpop.xlane.xlu1 %1074 }
 0x6c4   :  { %1129 = vst [vmem:[%s2156_s8 + $0x28] sm:$0xff] %v1113_v6  ;;  %v1118_v8 = vsub.f32 %v2022_v40, %v1097_v26  ;;  %v1099_v19 = vmul.f32 0.6931472, %v1622_v28  ;;  %1633 = vlog2.f32 %v1075_v29 }
 0x6c5   :  { %v1624_v31 = vpop.eup %1623 }
 0x6c6   :  { %1134 = vst [vmem:[%s2156_s8 + $0x50] sm:$0xff] %v1118_v8  ;;  %v1119_v32 = vsub.f32 %v2027_v45, %v1099_v19  ;;  %v1093_v35 = vmul.f32 0.6931472, %v1624_v31 }
 0x6c7   :  { %v1626_v11 = vpop.eup %1625 }
 0x6c8   :  { %1135 = vst [vmem:[%s2156_s8 + $0x58] sm:$0xff] %v1119_v32  ;;  %v1116_v5 = vsub.f32 %v2033_v50, %v1093_v35  ;;  %v1095_v7 = vmul.f32 0.6931472, %v1626_v11 }
 0x6c9   :  { %v1628_v36 = vpop.eup %1627 }
 0x6ca   :  { %1132 = vst [vmem:[%s2156_s8 + $0x40] sm:$0xff] %v1116_v5  ;;  %v1117_v40 = vsub.f32 %v2039_v55, %v1095_v7  ;;  %v1101_v9 = vmul.f32 0.6931472, %v1628_v36 }
 0x6cc   :  { %1133 = vst [vmem:[%s2156_s8 + $0x48] sm:$0xff] %v1117_v40  ;;  %v1120_v45 = vsub.f32 %v2043_v58, %v1101_v9 }
 0x6cd   :  { %v1630_v10 = vpop.eup %1629 }
 0x6ce   :  { %v1632_v37 = vpop.eup %1631  ;;  %1136 = vst [vmem:[%s2156_s8 + $0x60] sm:$0xff] %v1120_v45  ;;  %v1103_v50 = vmul.f32 0.6931472, %v1630_v10 }
 0x6cf   :  { %v1105_v38 = vmul.f32 0.6931472, %v1632_v37 }
 0x6d0   :  { %v1121_v39 = vsub.f32 %v2051_v2, %v1103_v50 }
 0x6d1   :  { %v1634_v41 = vpop.eup %1633  ;;  %v1122_v55 = vsub.f32 %v2054_v3, %v1105_v38 }
 0x6d2   :  { %1137 = vst [vmem:[%s2156_s8 + $0x68] sm:$0xff] %v1121_v39  ;;  %v1107_v42 = vmul.f32 0.6931472, %v1634_v41 }
 0x6d3   :  { %1138 = vst [vmem:[%s2156_s8 + $0x70] sm:$0xff] %v1122_v55 }
 0x6d4   :  { %v1123_v58 = vsub.f32 %v2063_v17, %v1107_v42 }
 0x6d6   :  { %1139 = vst [vmem:[%s2156_s8 + $0x78] sm:$0xff] %v1123_v58 }

</bundles_post_ra>
